<compile_context>
chip_gen: v6e
topology: v6e:2x2x1
jax: 0.10.0
libtpu: 0.0.40
codegen_flags: <defaults>
</compile_context>

<pallas_src>
import jax
import jax.numpy as jnp
from jax import lax
from jax.experimental import pallas as pl
from jax.experimental.pallas import tpu as pltpu

EPS = 1e-5          # PyTorch InstanceNorm2d default eps
NEG_SLOPE = 0.2     # LeakyReLU slope
KH = KW = 4
STRIDE = 2
PAD = 1
LANE = 128          # TPU lane width
TILE_CO = 128       # Cout tile per grid step (lane-dense, unmasked stores)


def _round_up(x, m):
    return (x + m - 1) // m * m


def _cnn_block_kernel(shifts_ref, w_ref, g_ref, b_ref, o_ref):
    # shifts_ref: (1, 2, Hq*Wo, K)   bf16, K = KW*Cin; two stride-2 row phases
    #                                of one image (Hq = Ho + 1 rows each) with
    #                                the 4 column taps folded into K.
    # w_ref:      (4, K, TILE_CO)    bf16, one (K, Cout-tile) matrix per kh.
    # g_ref:      (1, TILE_CO)  f32  InstanceNorm gamma (zeros in the pad).
    # b_ref:      (1, TILE_CO)  f32  InstanceNorm beta  (zeros in the pad).
    # o_ref:      (1, L, TILE_CO)    L = Ho*Wo, lane-dense output tile.
    l = o_ref.shape[1]
    tc = o_ref.shape[2]
    wo = shifts_ref.shape[2] - l          # Hq*Wo - Ho*Wo = Wo

    # ---- Conv2d(k=4, s=2, reflect-pad done in wrapper): 4 accumulated MXU
    # ---- matmuls with K = 4*Cin (bf16 operands, f32 accumulation).
    acc = jnp.zeros((l, tc), jnp.float32)
    for dh in range(2):                   # row offset  = kh // 2
        start = dh * wo                   # static, sublane-aligned (Wo % 8 == 0)
        for ph in range(2):               # row phase   = kh % 2
            kh = 2 * dh + ph
            win = shifts_ref[0, ph, start:start + l, :]        # (L, K) contiguous
            acc = acc + jnp.dot(win, w_ref[kh],
                                preferred_element_type=jnp.float32)

    # ---- One-pass InstanceNorm2d(affine=True) + LeakyReLU(0.2), all float32.
    inv_l = 1.0 / l
    s1 = jnp.sum(acc, axis=0, keepdims=True)                   # (1, TILE_CO)
    s2 = jnp.sum(acc * acc, axis=0, keepdims=True)             # (1, TILE_CO)
    mean = s1 * inv_l
    var = jnp.maximum(s2 * inv_l - mean * mean, 0.0)           # clamp f32 cancellation
    scale = g_ref[...] * lax.rsqrt(var + EPS)                  # gamma folded in
    shift = b_ref[...] - mean * scale
    y = acc * scale + shift
    y = jnp.maximum(y, NEG_SLOPE * y)                          # LeakyReLU(0.2)
    o_ref[0] = y.astype(o_ref.dtype)


def cnn_block_forward(x_nchw, w_oihw, gamma, beta, *, mxu_dtype=jnp.bfloat16):
    """CNNBlock forward. x_nchw: (N, Cin, H, W) -> (N, Cout, H//2, W//2)."""
    n, cin, h, w = x_nchw.shape
    cout = w_oihw.shape[0]
    assert h % 2 == 0 and w % 2 == 0, "stride-2 block expects even spatial dims"
    ho, wo = h // 2, w // 2
    assert wo % 8 == 0, "Wo must be a multiple of 8 (sublane-aligned window starts)"
    hq = ho + 1
    l = ho * wo
    k = KW * cin                          # folded contraction depth
    coutp = _round_up(cout, TILE_CO)      # lane-dense output / full MXU columns

    # NCHW -> NHWC, cast to bf16 FIRST (halves all wrapper HBM streams below),
    # then reflect pad (pad values are copies, so bf16 pad == pad-then-cast).
    x_nhwc = jnp.transpose(x_nchw, (0, 2, 3, 1)).astype(mxu_dtype)
    x_pad = jnp.pad(x_nhwc, ((0, 0), (PAD, PAD), (PAD, PAD), (0, 0)),
                    mode="reflect")

    # Shift planes with the 4 column taps folded into the contraction dim:
    #   shifts[n, ph, i'*Wo + j, kw*Cin + ci] = x_pad[n, 2*i' + ph, 2*j + kw, ci]
    # Total HBM volume ~= the f32 input size (bf16, 2 phases x 4 taps / stride 2).
    cols = [x_pad[:, :, kw:kw + STRIDE * (wo - 1) + 1:STRIDE, :]   # (N, Hp, Wo, Cin)
            for kw in range(KW)]
    x_cols = jnp.stack(cols, axis=3)                               # (N, Hp, Wo, KW, Cin)
    rows = [x_cols[:, ph:ph + STRIDE * (hq - 1) + 1:STRIDE]        # (N, Hq, Wo, KW, Cin)
            for ph in range(2)]
    shifts = jnp.stack(rows, axis=1)                               # (N, 2, Hq, Wo, KW, Cin)
    shifts = shifts.reshape(n, 2, hq * wo, k)

    # Per-kh weight matrices (K, Coutp): w_taps[kh, kw*Cin + ci, co] = w[co, ci, kh, kw].
    w_taps = jnp.transpose(w_oihw, (2, 3, 1, 0)).reshape(KH, k, cout)
    w_taps = jnp.pad(w_taps, ((0, 0), (0, 0), (0, coutp - cout))).astype(mxu_dtype)

    # Affine params stay float32 (epilogue is f32 on every TPU generation).
    g_pad = jnp.pad(gamma.astype(jnp.float32), (0, coutp - cout)).reshape(1, coutp)
    b_pad = jnp.pad(beta.astype(jnp.float32), (0, coutp - cout)).reshape(1, coutp)

    n_co = coutp // TILE_CO
    out = pl.pallas_call(
        _cnn_block_kernel,
        out_shape=jax.ShapeDtypeStruct((n, l, coutp), x_nchw.dtype),
        grid_spec=pltpu.PrefetchScalarGridSpec(
            num_scalar_prefetch=0,
            grid=(n, n_co),                     # Cout tile is the inner axis so the
            in_specs=[                          # per-image shift block isn't re-fetched
                pl.BlockSpec((1, 2, hq * wo, k), lambda b, j: (b, 0, 0, 0)),
                pl.BlockSpec((KH, k, TILE_CO), lambda b, j: (0, 0, j)),
                pl.BlockSpec((1, TILE_CO), lambda b, j: (0, j)),
                pl.BlockSpec((1, TILE_CO), lambda b, j: (0, j)),
            ],
            out_specs=pl.BlockSpec((1, l, TILE_CO), lambda b, j: (b, 0, j)),
        ),
        compiler_params=pltpu.CompilerParams(
            dimension_semantics=("parallel", "parallel"),  # independent steps;
            vmem_limit_bytes=32 * 1024 * 1024,             # shardable across v7x's 2 TCs
        ),
    )(shifts, w_taps, g_pad, b_pad)

    # Drop lane padding and return NCHW to match the PyTorch module.
    # TODO(synk): when chaining blocks, keep NHWC and transpose once at the
    # model boundary to avoid this extra output-sized HBM pass per block.
    out = out[:, :, :cout].reshape(n, ho, wo, cout)
    return jnp.transpose(out, (0, 3, 1, 2))


def cnn_block_reference(x_nchw, w_oihw, gamma, beta, *, operand_dtype=None):
    """Pure-JAX reference. operand_dtype rounds conv operands (to mirror bf16)."""
    x_nhwc = jnp.transpose(x_nchw, (0, 2, 3, 1))
    x_pad = jnp.pad(x_nhwc, ((0, 0), (PAD, PAD), (PAD, PAD), (0, 0)),
                    mode="reflect")
    w = w_oihw
    if operand_dtype is not None:
        x_pad = x_pad.astype(operand_dtype).astype(jnp.float32)
        w = w.astype(operand_dtype).astype(jnp.float32)
    w_hwio = jnp.transpose(w, (2, 3, 1, 0))
    conv = lax.conv_general_dilated(
        x_pad, w_hwio, window_strides=(STRIDE, STRIDE), padding="VALID",
        dimension_numbers=("NHWC", "HWIO", "NHWC"),
        precision=lax.Precision.HIGHEST)
    mean = jnp.mean(conv, axis=(1, 2), keepdims=True)
    var = jnp.mean((conv - mean) ** 2, axis=(1, 2), keepdims=True)
    y = (conv - mean) * lax.rsqrt(var + EPS) * gamma.reshape(1, 1, 1, -1) \
        + beta.reshape(1, 1, 1, -1)
    y = jnp.where(y > 0, y, NEG_SLOPE * y)
    return jnp.transpose(y, (0, 3, 1, 2))


if __name__ == "__main__":
    # Small shapes consistent with the module: batch=2, in_ch=4, out_ch=8, 16x16.
    N, Cin, Cout, H, W = 2, 4, 8, 16, 16

    key = jax.random.PRNGKey(0)
    kx, kw, kg, kb = jax.random.split(key, 4)
    x = jax.random.normal(kx, (N, Cin, H, W), dtype=jnp.float32)
    w = jax.random.normal(kw, (Cout, Cin, KH, KW), dtype=jnp.float32) * 0.1
    gamma = 1.0 + 0.1 * jax.random.normal(kg, (Cout,), dtype=jnp.float32)
    beta = 0.1 * jax.random.normal(kb, (Cout,), dtype=jnp.float32)

    fwd = jax.jit(cnn_block_forward)
    out = jax.block_until_ready(fwd(x, w, gamma, beta))

    # Reference with the same bf16 operand rounding (tight check of structure)
    # and the pure-f32 reference (loose check of overall module semantics).
    ref_bf16 = jax.block_until_ready(
        cnn_block_reference(x, w, gamma, beta, operand_dtype=jnp.bfloat16))
    ref_f32 = jax.block_until_ready(cnn_block_reference(x, w, gamma, beta))

    assert out.shape == (N, Cout, H // 2, W // 2), out.shape
    err_tight = float(jnp.max(jnp.abs(out - ref_bf16)))
    err_loose = float(jnp.max(jnp.abs(out - ref_f32)))
    assert jnp.allclose(out, ref_bf16, atol=1e-3, rtol=1e-3), err_tight
    assert jnp.allclose(out, ref_f32, atol=5e-2, rtol=5e-2), err_loose
    print("KERNEL_OK")
</pallas_src>

<mosaic_0001>
module attributes {stable_mosaic.version = 11 : i64} {
  func.func @_cnn_block_kernel(%arg0: i32, %arg1: i32, %arg2: memref<1x2x72x16xbf16, #tpu.memory_space<vmem>>, %arg3: memref<4x16x128xbf16, #tpu.memory_space<vmem>>, %arg4: memref<1x128xf32, #tpu.memory_space<vmem>>, %arg5: memref<1x128xf32, #tpu.memory_space<vmem>>, %arg6: memref<1x64x128xf32, #tpu.memory_space<vmem>>) attributes {dimension_semantics = [#tpu.dimension_semantics<parallel>, #tpu.dimension_semantics<parallel>], iteration_bounds = array<i64: 2, 1>, scalar_prefetch = 0 : i64, scratch_operands = 0 : i64, tpu.core_type = #tpu.core_type<tc>, window_params = [{transform_indices = @transform_0, window_bounds = array<i64: 1, 2, 72, 16>}, {transform_indices = @transform_1, window_bounds = array<i64: 4, 16, 128>}, {transform_indices = @transform_2, window_bounds = array<i64: 1, 128>}, {transform_indices = @transform_3, window_bounds = array<i64: 1, 128>}, {transform_indices = @transform_4, window_bounds = array<i64: 1, 64, 128>}]} {
    %cst = arith.constant 0.000000e+00 : f32
    %0 = vector.broadcast %cst : f32 to vector<64x128xf32>
    %c0 = arith.constant 0 : index
    %c0_0 = arith.constant 0 : index
    %c0_1 = arith.constant 0 : index
    %c0_2 = arith.constant 0 : index
    %1 = vector.load %arg2[%c0, %c0_0, %c0_1, %c0_2] : memref<1x2x72x16xbf16, #tpu.memory_space<vmem>>, vector<1x1x64x16xbf16>
    %2 = vector.shape_cast %1 : vector<1x1x64x16xbf16> to vector<64x16xbf16>
    %c0_3 = arith.constant 0 : index
    %c0_4 = arith.constant 0 : index
    %c0_5 = arith.constant 0 : index
    %3 = vector.load %arg3[%c0_3, %c0_4, %c0_5] : memref<4x16x128xbf16, #tpu.memory_space<vmem>>, vector<1x16x128xbf16>
    %4 = vector.shape_cast %3 : vector<1x16x128xbf16> to vector<16x128xbf16>
    %cst_6 = arith.constant dense<0.000000e+00> : vector<64x128xf32>
    %5 = tpu.matmul %2, %4, %cst_6 {dimension_numbers = #tpu.dot_dimension_numbers<[1], [0], [0], [1], [0, 0, 1, 1], [], []>} : vector<64x16xbf16>, vector<16x128xbf16>, vector<64x128xf32> -> vector<64x128xf32>
    %6 = arith.addf %0, %5 : vector<64x128xf32>
    %c0_7 = arith.constant 0 : index
    %c1 = arith.constant 1 : index
    %c0_8 = arith.constant 0 : index
    %c0_9 = arith.constant 0 : index
    %7 = vector.load %arg2[%c0_7, %c1, %c0_8, %c0_9] : memref<1x2x72x16xbf16, #tpu.memory_space<vmem>>, vector<1x1x64x16xbf16>
    %8 = vector.shape_cast %7 : vector<1x1x64x16xbf16> to vector<64x16xbf16>
    %c1_10 = arith.constant 1 : index
    %c0_11 = arith.constant 0 : index
    %c0_12 = arith.constant 0 : index
    %9 = vector.load %arg3[%c1_10, %c0_11, %c0_12] : memref<4x16x128xbf16, #tpu.memory_space<vmem>>, vector<1x16x128xbf16>
    %10 = vector.shape_cast %9 : vector<1x16x128xbf16> to vector<16x128xbf16>
    %cst_13 = arith.constant dense<0.000000e+00> : vector<64x128xf32>
    %11 = tpu.matmul %8, %10, %cst_13 {dimension_numbers = #tpu.dot_dimension_numbers<[1], [0], [0], [1], [0, 0, 1, 1], [], []>} : vector<64x16xbf16>, vector<16x128xbf16>, vector<64x128xf32> -> vector<64x128xf32>
    %12 = arith.addf %6, %11 : vector<64x128xf32>
    %c0_14 = arith.constant 0 : index
    %c0_15 = arith.constant 0 : index
    %c8 = arith.constant 8 : index
    %c0_16 = arith.constant 0 : index
    %13 = vector.load %arg2[%c0_14, %c0_15, %c8, %c0_16] : memref<1x2x72x16xbf16, #tpu.memory_space<vmem>>, vector<1x1x64x16xbf16>
    %14 = vector.shape_cast %13 : vector<1x1x64x16xbf16> to vector<64x16xbf16>
    %c2 = arith.constant 2 : index
    %c0_17 = arith.constant 0 : index
    %c0_18 = arith.constant 0 : index
    %15 = vector.load %arg3[%c2, %c0_17, %c0_18] : memref<4x16x128xbf16, #tpu.memory_space<vmem>>, vector<1x16x128xbf16>
    %16 = vector.shape_cast %15 : vector<1x16x128xbf16> to vector<16x128xbf16>
    %cst_19 = arith.constant dense<0.000000e+00> : vector<64x128xf32>
    %17 = tpu.matmul %14, %16, %cst_19 {dimension_numbers = #tpu.dot_dimension_numbers<[1], [0], [0], [1], [0, 0, 1, 1], [], []>} : vector<64x16xbf16>, vector<16x128xbf16>, vector<64x128xf32> -> vector<64x128xf32>
    %18 = arith.addf %12, %17 : vector<64x128xf32>
    %c0_20 = arith.constant 0 : index
    %c1_21 = arith.constant 1 : index
    %c8_22 = arith.constant 8 : index
    %c0_23 = arith.constant 0 : index
    %19 = vector.load %arg2[%c0_20, %c1_21, %c8_22, %c0_23] : memref<1x2x72x16xbf16, #tpu.memory_space<vmem>>, vector<1x1x64x16xbf16>
    %20 = vector.shape_cast %19 : vector<1x1x64x16xbf16> to vector<64x16xbf16>
    %c3 = arith.constant 3 : index
    %c0_24 = arith.constant 0 : index
    %c0_25 = arith.constant 0 : index
    %21 = vector.load %arg3[%c3, %c0_24, %c0_25] : memref<4x16x128xbf16, #tpu.memory_space<vmem>>, vector<1x16x128xbf16>
    %22 = vector.shape_cast %21 : vector<1x16x128xbf16> to vector<16x128xbf16>
    %cst_26 = arith.constant dense<0.000000e+00> : vector<64x128xf32>
    %23 = tpu.matmul %20, %22, %cst_26 {dimension_numbers = #tpu.dot_dimension_numbers<[1], [0], [0], [1], [0, 0, 1, 1], [], []>} : vector<64x16xbf16>, vector<16x128xbf16>, vector<64x128xf32> -> vector<64x128xf32>
    %24 = arith.addf %18, %23 : vector<64x128xf32>
    %cst_27 = arith.constant dense<0.000000e+00> : vector<128xf32>
    %25 = vector.multi_reduction <add>, %24, %cst_27 [0] : vector<64x128xf32> to vector<128xf32>
    %26 = vector.shape_cast %25 : vector<128xf32> to vector<1x128xf32>
    %27 = arith.mulf %24, %24 : vector<64x128xf32>
    %cst_28 = arith.constant dense<0.000000e+00> : vector<128xf32>
    %28 = vector.multi_reduction <add>, %27, %cst_28 [0] : vector<64x128xf32> to vector<128xf32>
    %29 = vector.shape_cast %28 : vector<128xf32> to vector<1x128xf32>
    %cst_29 = arith.constant 1.562500e-02 : f32
    %30 = vector.broadcast %cst_29 : f32 to vector<1x128xf32>
    %31 = arith.mulf %26, %30 : vector<1x128xf32>
    %cst_30 = arith.constant 1.562500e-02 : f32
    %32 = vector.broadcast %cst_30 : f32 to vector<1x128xf32>
    %33 = arith.mulf %29, %32 : vector<1x128xf32>
    %34 = arith.mulf %31, %31 : vector<1x128xf32>
    %35 = arith.subf %33, %34 : vector<1x128xf32>
    %cst_31 = arith.constant 0.000000e+00 : f32
    %36 = vector.broadcast %cst_31 : f32 to vector<1x128xf32>
    %37 = arith.maximumf %35, %36 : vector<1x128xf32>
    %c0_32 = arith.constant 0 : index
    %c0_33 = arith.constant 0 : index
    %38 = vector.load %arg4[%c0_32, %c0_33] : memref<1x128xf32, #tpu.memory_space<vmem>>, vector<1x128xf32>
    %cst_34 = arith.constant 9.99999974E-6 : f32
    %39 = vector.broadcast %cst_34 : f32 to vector<1x128xf32>
    %40 = arith.addf %37, %39 : vector<1x128xf32>
    %41 = math.rsqrt %40 : vector<1x128xf32>
    %42 = arith.mulf %38, %41 : vector<1x128xf32>
    %c0_35 = arith.constant 0 : index
    %c0_36 = arith.constant 0 : index
    %43 = vector.load %arg5[%c0_35, %c0_36] : memref<1x128xf32, #tpu.memory_space<vmem>>, vector<1x128xf32>
    %44 = arith.mulf %31, %42 : vector<1x128xf32>
    %45 = arith.subf %43, %44 : vector<1x128xf32>
    %46 = vector.broadcast %42 : vector<1x128xf32> to vector<64x128xf32>
    %47 = arith.mulf %24, %46 : vector<64x128xf32>
    %48 = vector.broadcast %45 : vector<1x128xf32> to vector<64x128xf32>
    %49 = arith.addf %47, %48 : vector<64x128xf32>
    %cst_37 = arith.constant 2.000000e-01 : f32
    %50 = vector.broadcast %cst_37 : f32 to vector<64x128xf32>
    %51 = arith.mulf %50, %49 : vector<64x128xf32>
    %52 = arith.maximumf %49, %51 : vector<64x128xf32>
    %c0_38 = arith.constant 0 : index
    %c0_39 = arith.constant 0 : index
    %c0_40 = arith.constant 0 : index
    %53 = vector.load %arg6[%c0_38, %c0_39, %c0_40] : memref<1x64x128xf32, #tpu.memory_space<vmem>>, vector<1x64x128xf32>
    %54 = vector.shape_cast %53 : vector<1x64x128xf32> to vector<64x128xf32>
    %55 = vector.shape_cast %52 : vector<64x128xf32> to vector<1x64x128xf32>
    tpu.vector_store %arg6[%c0_38, %c0_39, %c0_40], %55 {strides = array<i32>} : memref<1x64x128xf32, #tpu.memory_space<vmem>>, vector<1x64x128xf32>,
    return
  }
  func.func @transform_0(%arg0: i32, %arg1: i32) -> (i32, i32, i32, i32) {
    %c0_i32 = arith.constant 0 : i32
    %c0_i32_0 = arith.constant 0 : i32
    %c0_i32_1 = arith.constant 0 : i32
    %c0_i32_2 = arith.constant 0 : i32
    return %arg0, %c0_i32, %c0_i32_0, %c0_i32_1 : i32, i32, i32, i32
  }
  func.func @transform_1(%arg0: i32, %arg1: i32) -> (i32, i32, i32) {
    %c0_i32 = arith.constant 0 : i32
    %c0_i32_0 = arith.constant 0 : i32
    %c0_i32_1 = arith.constant 0 : i32
    return %c0_i32, %c0_i32_0, %arg1 : i32, i32, i32
  }
  func.func @transform_2(%arg0: i32, %arg1: i32) -> (i32, i32) {
    %c0_i32 = arith.constant 0 : i32
    %c0_i32_0 = arith.constant 0 : i32
    return %c0_i32, %arg1 : i32, i32
  }
  func.func @transform_3(%arg0: i32, %arg1: i32) -> (i32, i32) {
    %c0_i32 = arith.constant 0 : i32
    %c0_i32_0 = arith.constant 0 : i32
    return %c0_i32, %arg1 : i32, i32
  }
  func.func @transform_4(%arg0: i32, %arg1: i32) -> (i32, i32, i32) {
    %c0_i32 = arith.constant 0 : i32
    %c0_i32_0 = arith.constant 0 : i32
    return %arg0, %c0_i32, %arg1 : i32, i32, i32
  }
}

</mosaic_0001>

<bundles_post_ra>
// kernel: cnn_block_forward.1
= control target key start
LH: loop header
LB: loop body
LE: loop exit
PB: predicated region body
PF: predicated region fallthrough
CT: control target
= control target key end

     0   :  { %s1180_s15 = smov 0   ;;  %s1182_s16 = smov 0   ;;  %s1293_s0 = inlined_call_operand.vmem [shape: bf16[2,2,72,16], index: 0, kind: input, shape index: {}]   ;;  %s1294_s1 = inlined_call_operand.vmem [shape: bf16[4,16,128], index: 1, kind: input, shape index: {}]   ;;  %s1295_s2 = inlined_call_operand.vmem [shape: f32[1,128], index: 2, kind: input, shape index: {}]   ;;  %s1296_s3 = inlined_call_operand.vmem [shape: f32[1,128], index: 3, kind: input, shape index: {}]   ;;  %s1297_s4 = inlined_call_operand.vmem [shape: f32[2,64,128], index: 4, kind: output, shape index: {}]  }
   0x1   :  { %s1184_s17 = smov 0  }
   0x2 LB: > { %s26_s18 = sadd.s32 1, %s1149_s16  ;;  %p959_p0 = scmp.ge.s32.totalorder %s1153_s17, 1  ;;  %s1153_s17 = sphi %s1184_s17, %s14_s17   ;;  %s1149_s16 = sphi %s1182_s16, %s1299_s16   ;;  %s1145_s15 = sphi %s1180_s15, %s1298_s15  }
   0x3   : > { %p28_p1 = scmp.ge.s32.totalorder %s26_s18, 2  ;;  %p201_p2 = scmp.lt.s32.totalorder %s1153_s17, 3 }
   0x5   : > { %s1301_s18 = smov (%p28_p1, %s26_s18), 0  ;;  %p202_p3 = pnand %p959_p0, %p201_p2 }
   0x6   : > { %p240_p4 = scmp.lt.s32.totalorder (!%p202_p3), %s1145_s15, 1 }
   0x7   : > { %205 = sbr.rel (%p202_p3) target bundleno = 305 (0x131), region = 36 }
   0xc   : > { %v1109_v0 = vld [vmem:[%s1294_s1 + $0x8] sm:$0xff]   ;;  %v1110_v1 = vld [vmem:[%s1294_s1] sm:$0xff]   ;;  %s1303_s15 = smov (!%p240_p4, %s1145_s15), 1  ;;  %v1113_v2 = vld [vmem:[%s1294_s1 + $0x10] sm:$0xff]   ;;  %vm312_vm0 = vcmask 130048  }
   0xd   : > { %1044 = vmatprep.subr.bf16.mxu0 %v1109_v0  ;;  %1054 = vmatprep.subr.bf16.mxu1 %v1110_v1  ;;  %v1116_v3 = vld [vmem:[%s1294_s1 + $0x18] sm:$0xff]   ;;  %s1084_s27 = smul.u32 72, %s1303_s15  ;;  %s1023_s9 = sshll.u32 %s1303_s15, 6 }
   0xe   : > { %1045 = vmatpush3.bf16.msra.mxu0 %v1109_v0  ;;  %1055 = vmatpush3.bf16.msra.mxu1 %v1110_v1  ;;  %s262_s12 = scalar_lea.vmem %s1297_s4, %s1023_s9 }
   0xf   : > { %1064 = vmatprep.subr.bf16.mxu0 %v1113_v2  ;;  %1074 = vmatprep.subr.bf16.mxu1 %v1116_v3  ;;  %s1216_s30 = scalar_lea.vmem %s1293_s0, %s1084_s27 }
  0x10   : > { %v1111_v4 = vld [vmem:[%s1216_s30 + $0x24] sm:$0xff]   ;;  %v1114_v6 = vld [vmem:[%s1216_s30 + $0x2c] sm:$0xff]   ;;  %v1117_v8 = vld [vmem:[%s1216_s30 + $0x34] sm:$0xff]  }
  0x11   : > { %v1112_v5 = vld [vmem:[%s1216_s30] sm:$0xff]   ;;  %1046 = vmatprep.mubr.msk.bf16.mxu0 %vm312_vm0, %v1111_v4  ;;  %v1115_v7 = vld [vmem:[%s1216_s30 + $0x8] sm:$0xff]   ;;  %v1118_v9 = vld [vmem:[%s1216_s30 + $0x10] sm:$0xff]  }
  0x12   : > { %1056 = vmatprep.mubr.msk.bf16.mxu1 %vm312_vm0, %v1112_v5  ;;  %1047 = vmatmul.mubr.msk.bf16.vlgmr.msra.gmra.mxu0 %vm312_vm0, %v1114_v6  ;;  %v1119_v10 = vld [vmem:[%s1216_s30 + $0x3c] sm:$0xff]   ;;  %v1121_v12 = vld [vmem:[%s1216_s30 + $0x4] sm:$0xff]   ;;  %v1123_v14 = vld [vmem:[%s1216_s30 + $0xc] sm:$0xff]  }
  0x13   : > { %1057 = vmatmul.mubr.msk.bf16.vlgmr.msra.gmra.mxu1 %vm312_vm0, %v1115_v7  ;;  %1065 = vmatpush3.bf16.msra.mxu0 %v1113_v2  ;;  %v1120_v11 = vld [vmem:[%s1216_s30 + $0x18] sm:$0xff]   ;;  %v1122_v13 = vld [vmem:[%s1216_s30 + $0x28] sm:$0xff]   ;;  %v1124_v15 = vld [vmem:[%s1216_s30 + $0x30] sm:$0xff]  }
  0x14   : > { %1075 = vmatpush3.bf16.msra.mxu1 %v1116_v3  ;;  %1050 = vmatprep.mubr.msk.bf16.mxu0 %vm312_vm0, %v1117_v8  ;;  %v1125_v16 = vld [vmem:[%s1216_s30 + $0x14] sm:$0xff]   ;;  %v1127_v18 = vld [vmem:[%s1216_s30 + $0x1c] sm:$0xff]  }
  0x15   : > { %1060 = vmatprep.mubr.msk.bf16.mxu1 %vm312_vm0, %v1118_v9  ;;  %v1126_v17 = vld [vmem:[%s1216_s30 + $0x38] sm:$0xff]   ;;  %v1128_v19 = vld [vmem:[%s1216_s30 + $0x40] sm:$0xff]  }
  0x1a   : > { %1051 = vmatmul.mubr.msk.bf16.gmra.mxu0 %vm312_vm0, %v1119_v10 }
  0x1b   : > { %1061 = vmatmul.mubr.msk.bf16.gmra.mxu1 %vm312_vm0, %v1120_v11  ;;  %1066 = vmatprep.mubr.msk.bf16.mxu0 %vm312_vm0, %v1121_v12 }
  0x1c   : > { %1076 = vmatprep.mubr.msk.bf16.mxu1 %vm312_vm0, %v1122_v13 }
  0x22   : > { %1067 = vmatmul.mubr.msk.bf16.vlgmr.msra.gmra.mxu0 %vm312_vm0, %v1123_v14 }
  0x23   : > { %1077 = vmatmul.mubr.msk.bf16.vlgmr.msra.gmra.mxu1 %vm312_vm0, %v1124_v15  ;;  %1070 = vmatprep.mubr.msk.bf16.mxu0 %vm312_vm0, %v1125_v16 }
  0x24   : > { %1080 = vmatprep.mubr.msk.bf16.mxu1 %vm312_vm0, %v1126_v17 }
  0x2a   : > { %1071 = vmatmul.mubr.msk.bf16.gmra.mxu0 %vm312_vm0, %v1127_v18 }
  0x2b   : > { %1081 = vmatmul.mubr.msk.bf16.gmra.mxu1 %vm312_vm0, %v1128_v19 }
  0xd2   : > { %v1048_v20 = vpop.f32.mrf.mxu0 }
  0xd3   : > { %v1058_v21 = vpop.f32.mrf.mxu1 }
  0xd4   : > { %v359_v22 = vpop.f32.mrf.mxu0  ;;  %v471_v40 = vadd.f32 %v1058_v21, %v1048_v20 }
  0xd5   : > { %v462_v23 = vpop.f32.mrf.mxu1 }
  0xd6   : > { %v1049_v24 = vpop.f32.mrf.mxu0  ;;  %v463_v37 = vadd.f32 %v462_v23, %v359_v22 }
  0xd7   : > { %v1059_v25 = vpop.f32.mrf.mxu1 }
  0xd8   : > { %v362_v26 = vpop.f32.mrf.mxu0  ;;  %v474_v43 = vadd.f32 %v1059_v25, %v1049_v24 }
  0xd9   : > { %v465_v27 = vpop.f32.mrf.mxu1 }
  0xda   : > { %v1052_v28 = vpop.f32.mrf.mxu0  ;;  %v466_v45 = vadd.f32 %v465_v27, %v362_v26 }
  0xdb   : > { %v1062_v29 = vpop.f32.mrf.mxu1 }
  0xdc   : > { %v375_v30 = vpop.f32.mrf.mxu0  ;;  %v487_v58 = vadd.f32 %v1062_v29, %v1052_v28 }
  0xdd   : > { %v478_v31 = vpop.f32.mrf.mxu1 }
  0xde   : > { %v1053_v32 = vpop.f32.mrf.mxu0  ;;  %v479_v54 = vadd.f32 %v478_v31, %v375_v30 }
  0xdf   : > { %v1063_v33 = vpop.f32.mrf.mxu1 }
  0xe0   : > { %v378_v34 = vpop.f32.mrf.mxu0  ;;  %v490_v2 = vadd.f32 %v1063_v33, %v1053_v32 }
  0xe1   : > { %v481_v35 = vpop.f32.mrf.mxu1 }
  0xe2   : > { %v1068_v36 = vpop.f32.mrf.mxu0  ;;  %v482_v3 = vadd.f32 %v481_v35, %v378_v34 }
  0xe3   : > { %v1078_v38 = vpop.f32.mrf.mxu1  ;;  %v609_v46 = vadd.f32 %v1068_v36, %v471_v40 }
  0xe4   : > { %v576_v39 = vpop.f32.mrf.mxu0 }
  0xe5   : > { %v607_v41 = vadd.f32 %v576_v39, %v463_v37  ;;  %v698_v42 = vpop.f32.mrf.mxu1  ;;  %v1252_v55 = vadd.f32 %v1078_v38, %v609_v46 }
  0xe6   : > { %v1069_v44 = vpop.f32.mrf.mxu0 }
  0xe7   : > { %v1079_v47 = vpop.f32.mrf.mxu1  ;;  %v610_v48 = vadd.f32 %v1069_v44, %v474_v43  ;;  %v1250_v50 = vadd.f32 %v698_v42, %v607_v41  ;;  %v752_v6 = vmul.f32 %v1252_v55, %v1252_v55 }
  0xe8   : > { %v579_v49 = vpop.f32.mrf.mxu0 }
  0xe9   : > { %v608_v51 = vadd.f32 %v579_v49, %v466_v45  ;;  %v701_v52 = vpop.f32.mrf.mxu1  ;;  %v1256_v59 = vadd.f32 %v1079_v47, %v610_v48  ;;  %v750_v61 = vmul.f32 %v1250_v50, %v1250_v50 }
  0xea   : > { %v1072_v53 = vpop.f32.mrf.mxu0 }
  0xeb   : > { %v1254_v56 = vadd.f32 %v701_v52, %v608_v51  ;;  %v1082_v57 = vpop.f32.mrf.mxu1  ;;  %v613_v4 = vadd.f32 %v1072_v53, %v487_v58  ;;  %v753_v11 = vmul.f32 %v1256_v59, %v1256_v59  ;;  %v784_v53 = vlaneseq }
  0xec   : > { %v592_v60 = vpop.f32.mrf.mxu0 }
  0xed   : > { %v737_v62 = vadd.f32 %v1254_v56, %v1250_v50  ;;  %v751_v63 = vmul.f32 %v1254_v56, %v1254_v56  ;;  %v611_v0 = vadd.f32 %v592_v60, %v479_v54  ;;  %v714_v1 = vpop.f32.mrf.mxu1  ;;  %v735_v17 = vadd.f32 %v1082_v57, %v613_v4  ;;  %v776_v57 = vld [vmem:[%s1295_s2] sm:$0x1] }
  0xee   : > { %v1073_v5 = vpop.f32.mrf.mxu0  ;;  %v785_v54 = vshrl.u32 %v784_v53, 7 }
  0xef   : > { %v738_v7 = vadd.f32 %v737_v62, %v1252_v55  ;;  %v758_v8 = vadd.f32 %v751_v63, %v750_v61  ;;  %v733_v9 = vadd.f32 %v714_v1, %v611_v0  ;;  %v1083_v10 = vpop.f32.mrf.mxu1  ;;  %v614_v15 = vadd.f32 %v1073_v5, %v490_v2  ;;  %v780_v62 = vld [vmem:[%s1296_s3] sm:$0x1] }
  0xf0   : > { %v595_v12 = vpop.f32.mrf.mxu0  ;;  %v756_v27 = vmul.f32 %v735_v17, %v735_v17  ;;  %v786_v58 = vsub.s32 0, %v785_v54 }
  0xf1   : > { %v759_v13 = vadd.f32 %v758_v8, %v752_v6  ;;  %v739_v14 = vadd.f32 %v738_v7, %v1256_v59  ;;  %v612_v16 = vadd.f32 %v595_v12, %v482_v3  ;;  %v717_v18 = vpop.f32.mrf.mxu1  ;;  %v754_v20 = vmul.f32 %v733_v9, %v733_v9 }
  0xf2   : > { %v736_v24 = vadd.f32 %v1083_v10, %v614_v15 }
  0xf3   : > { %v740_v19 = vadd.f32 %v739_v14, %v733_v9  ;;  %v760_v21 = vadd.f32 %v759_v13, %v753_v11  ;;  %v734_v22 = vadd.f32 %v717_v18, %v612_v16 }
  0xf4   : > { %v757_v30 = vmul.f32 %v736_v24, %v736_v24 }
  0xf5   : > { %v761_v23 = vadd.f32 %v760_v21, %v754_v20  ;;  %v741_v25 = vadd.f32 %v740_v19, %v734_v22  ;;  %v755_v26 = vmul.f32 %v734_v22, %v734_v22 }
  0xf7   : > { %v742_v28 = vadd.f32 %v741_v25, %v735_v17  ;;  %v762_v29 = vadd.f32 %v761_v23, %v755_v26 }
  0xf9   : > { %v743_v31 = vadd.f32 %v742_v28, %v736_v24  ;;  %v763_v32 = vadd.f32 %v762_v29, %v756_v27 }
  0xfb   : > { %v744_v33 = vrot.slane %v743_v31, 4  ;;  %v764_v34 = vadd.f32 %v763_v32, %v757_v30 }
  0xfd   : > { %v745_v35 = vadd.f32 %v744_v33, %v743_v31  ;;  %v765_v36 = vrot.slane %v764_v34, 4 }
  0xff   : > { %v746_v37 = vrot.slane %v745_v35, 2  ;;  %v766_v38 = vadd.f32 %v765_v36, %v764_v34 }
 0x101   : > { %v747_v39 = vadd.f32 %v746_v37, %v745_v35  ;;  %v767_v40 = vrot.slane %v766_v38, 2 }
 0x103   : > { %v748_v41 = vrot.slane %v747_v39, 1  ;;  %v768_v42 = vadd.f32 %v767_v40, %v766_v38 }
 0x105   : > { %v749_v43 = vadd.f32 %v748_v41, %v747_v39  ;;  %v769_v44 = vrot.slane %v768_v42, 1 }
 0x107   : > { %v770_v45 = vadd.f32 %v769_v44, %v768_v42  ;;  %v771_v46 = vmul.f32 0.015625, %v749_v43 }
 0x109   : > { %v772_v47 = vmul.f32 0.015625, %v770_v45  ;;  %v773_v48 = vmul.f32 %v771_v46, %v771_v46 }
 0x10b   : > { %v774_v49 = vsub.f32 %v772_v47, %v773_v48 }
 0x10d   : > { %v775_v51 = vmax.f32 %v774_v49, 0.0 }
 0x10f   : > { %v777_v52 = vadd.f32 1e-05, %v775_v51 }
 0x111   : > { %1129 = vrsqrt.f32 %v777_v52 }
 0x11e   : > { %v1130_v60 = vpop.eup %1129 }
 0x11f   : > { %v779_v61 = vmul.f32 %v1130_v60, %v776_v57 }
 0x121   : > { %v781_v63 = vmul.f32 %v779_v61, %v771_v46  ;;  %v787_v0 = vrot.slane %v779_v61, %v786_v58 }
 0x123   : > { %v782_v1 = vsub.f32 %v780_v62, %v781_v63  ;;  %v789_v2 = vmul.f32 %v787_v0, %v1250_v50  ;;  %v790_v3 = vmul.f32 %v787_v0, %v1254_v56  ;;  %v791_v4 = vmul.f32 %v787_v0, %v1252_v55 }
 0x124   : > { %v792_v5 = vmul.f32 %v787_v0, %v1256_v59  ;;  %v793_v7 = vmul.f32 %v787_v0, %v733_v9  ;;  %v794_v8 = vmul.f32 %v787_v0, %v734_v22  ;;  %v795_v10 = vmul.f32 %v787_v0, %v735_v17 }
 0x125   : > { %v801_v6 = vrot.slane %v782_v1, %v786_v58  ;;  %v796_v11 = vmul.f32 %v787_v0, %v736_v24 }
 0x127   : > { %v803_v12 = vadd.f32 %v801_v6, %v789_v2  ;;  %v804_v13 = vadd.f32 %v801_v6, %v790_v3  ;;  %v805_v14 = vadd.f32 %v801_v6, %v791_v4  ;;  %v806_v15 = vadd.f32 %v801_v6, %v792_v5 }
 0x128   : > { %v807_v16 = vadd.f32 %v801_v6, %v793_v7  ;;  %v808_v18 = vadd.f32 %v801_v6, %v794_v8  ;;  %v809_v19 = vadd.f32 %v801_v6, %v795_v10  ;;  %v810_v50 = vadd.f32 %v801_v6, %v796_v11 }
 0x129   : > { %v811_v20 = vmul.f32 0.2, %v803_v12  ;;  %v812_v56 = vmul.f32 0.2, %v804_v13  ;;  %v813_v21 = vmul.f32 0.2, %v805_v14 }
 0x12a   : > { %v814_v55 = vmul.f32 0.2, %v806_v15  ;;  %v815_v59 = vmul.f32 0.2, %v807_v16  ;;  %v816_v9 = vmul.f32 0.2, %v808_v18 }
 0x12b   : > { %v817_v17 = vmul.f32 0.2, %v809_v19  ;;  %v818_v22 = vmul.f32 0.2, %v810_v50  ;;  %v819_v23 = vmax.f32 %v803_v12, %v811_v20  ;;  %v820_v24 = vmax.f32 %v804_v13, %v812_v56 }
 0x12c   : > { %v821_v25 = vmax.f32 %v805_v14, %v813_v21  ;;  %v822_v26 = vmax.f32 %v806_v15, %v814_v55  ;;  %v823_v27 = vmax.f32 %v807_v16, %v815_v59  ;;  %v824_v28 = vmax.f32 %v808_v18, %v816_v9 }
 0x12d   : > { %v825_v29 = vmax.f32 %v809_v19, %v817_v17  ;;  %v826_v30 = vmax.f32 %v810_v50, %v818_v22  ;;  %827 = vst [vmem:[%s262_s12] sm:$0xff] %v819_v23  ;;  %828 = vst [vmem:[%s262_s12 + $0x8] sm:$0xff] %v820_v24 }
 0x12e   : > { %829 = vst [vmem:[%s262_s12 + $0x10] sm:$0xff] %v821_v25  ;;  %830 = vst [vmem:[%s262_s12 + $0x18] sm:$0xff] %v822_v26 }
 0x12f   : > { %831 = vst [vmem:[%s262_s12 + $0x20] sm:$0xff] %v823_v27  ;;  %832 = vst [vmem:[%s262_s12 + $0x28] sm:$0xff] %v824_v28 }
 0x130   : > { %833 = vst [vmem:[%s262_s12 + $0x30] sm:$0xff] %v825_v29  ;;  %834 = vst [vmem:[%s262_s12 + $0x38] sm:$0xff] %v826_v30 }
 0x131 PF: > { %s14_s17 = sadd.s32 1, %s1153_s17   ;;  %s1298_s15 = smov %s1149_s16 }
 0x132   : > { %p11_p5 = scmp.ge.s32.totalorder %s14_s17, 4   ;;  %s1299_s16 = smov %s1301_s18 }
 0x134   :  { %13 = sbr.rel (!%p11_p5) target bundleno = 2 (0x2), region = 79 }

</bundles_post_ra>
